<compile_context>
chip_gen: v6e
topology: v6e:2x2x1
jax: 0.10.0
libtpu: 0.0.40
codegen_flags: <defaults>
</compile_context>

<pallas_src>
import functools

import jax
import jax.numpy as jnp
from jax import lax
from jax.experimental import pallas as pl
from jax.experimental.pallas import tpu as pltpu


def _round_up(x, m):
    return ((x + m - 1) // m) * m


def _cdiv(a, b):
    return -(-a // b)


def _pick_time_chunk(T, Bp, G, I, budget_bytes=4 << 20, cap=128):
    """Largest chunk whose xw scratch + double-buffered x chunk fits budget."""
    per_step = (Bp * G + 2 * Bp * I) * 4
    return max(1, min(T, cap, budget_bytes // per_step))


def lstm_fc_kernel(x_ref, w_ih_ref, w_hh_ref, b_ref, w_fc_ref, b_fc_ref,
                   out_ref, xw_ref, h_ref, c_ref,
                   *, t_chunk, batch_pad, hidden, gate_width, seq_len,
                   mask_tail, unroll):
    """One grid step processes `t_chunk` timesteps of the LSTM recurrence.

    x_ref:    (t_chunk*Bp, I)  time-major, batch padded to Bp
    w_ih_ref: (I, G)           packed gate order [i,f,g,o], 4H cols padded to G
    w_hh_ref: (G, G)           rows H:G are zero (garbage h lanes are inert)
    b_ref:    (1, G)           b_ih + b_hh, gate-packed
    w_fc_ref: (G, Op)          rows H:G are zero
    b_fc_ref: (1, Op)
    out_ref:  (Bp, Op)         written only on the last chunk
    xw_ref:   (t_chunk*Bp, G)  VMEM scratch (hoisted input projection)
    h_ref/c_ref: (Bp, G)       lane-dense carries; only lanes [0, H) meaningful
    """
    H, G, Bp = hidden, gate_width, batch_pad
    bf16 = jnp.bfloat16
    chunk = pl.program_id(0)
    last = pl.num_programs(0) - 1

    @pl.when(chunk == 0)
    def _init():
        h_ref[...] = jnp.zeros_like(h_ref)
        c_ref[...] = jnp.zeros_like(c_ref)

    # Hoisted input projection: one chunk-wide MXU matmul (bf16 operands,
    # f32 accumulation), bias folded in.  The recurrence only does h @ W_hh.
    xw_ref[...] = (
        jnp.dot(x_ref[...].astype(bf16), w_ih_ref[...].astype(bf16),
                preferred_element_type=jnp.float32)
        + b_ref[...])

    # Hoist the loop-invariant recurrent weights into vregs only when small.
    hoist_whh = (G * G * 2) <= (64 * 1024)
    w_hh_hoisted = w_hh_ref[...].astype(bf16) if hoist_whh else None

    def step(t, carry):
        h, c = carry
        rhs = w_hh_hoisted if hoist_whh else w_hh_ref[...].astype(bf16)
        row = pl.multiple_of(t * Bp, Bp)
        gates = xw_ref[pl.ds(row, Bp), :] + jnp.dot(
            h.astype(bf16), rhs, preferred_element_type=jnp.float32)  # (Bp, G)
        # One EUP pass each over the full packed block.
        sig = jax.nn.sigmoid(gates)          # lanes: [i | f | (unused) | o]
        tnh = jnp.tanh(gates)                # lanes: [.. | .. | g | ..]
        # De-interleave gates into lanes [0, H) via XLU lane rotations.
        f_g = pltpu.roll(sig, G - 1 * H, axis=1)
        g_g = pltpu.roll(tnh, G - 2 * H, axis=1)
        o_g = pltpu.roll(sig, G - 3 * H, axis=1)
        c_new = f_g * c + sig * g_g          # lanes [0, H) = real cell state
        h_new = o_g * jnp.tanh(c_new)        # lanes [H, G) garbage but finite;
        #                                      they hit zero rows of W_hh/W_fc.
        if mask_tail:
            valid = (chunk * t_chunk + t) < seq_len
            h_new = jnp.where(valid, h_new, h)
            c_new = jnp.where(valid, c_new, c)
        return h_new, c_new

    h_last, c_last = lax.fori_loop(0, t_chunk, step,
                                   (h_ref[...], c_ref[...]), unroll=unroll)
    h_ref[...] = h_last
    c_ref[...] = c_last

    @pl.when(chunk == last)
    def _finalize():
        # fc1 on all timesteps then x[:, -1, :] == fc1(last hidden).  Kept in
        # f32 (runs once, off the serial chain).
        out_ref[...] = (
            jnp.dot(h_last, w_fc_ref[...], preferred_element_type=jnp.float32)
            + b_fc_ref[...])


def rnn_forward(x, w_ih, w_hh, b_ih, b_hh, w_fc, b_fc):
    """x: (B, T, I) float32 -> (B, O) float32, matching RNN.forward."""
    B, T, I = x.shape
    H = w_ih.shape[0] // 4
    O = w_fc.shape[0]
    f32 = jnp.float32

    Bp = _round_up(B, 8)            # sublane-friendly batch
    G = _round_up(4 * H, 128)       # packed gate width (lane-dense)
    Op = _round_up(O, 128)          # lane-dense FC output

    t_chunk = _pick_time_chunk(T, Bp, G, I)
    num_chunks = _cdiv(T, t_chunk)
    T_pad = num_chunks * t_chunk
    mask_tail = (T_pad != T)
    unroll = min(t_chunk, 8)

    # Batch/time-pad, time-major, flatten: one contiguous (Bp, I) row-block
    # per timestep.
    xp = jnp.zeros((Bp, T_pad, I), f32).at[:B, :T].set(x.astype(f32))
    x_flat = jnp.transpose(xp, (1, 0, 2)).reshape(T_pad * Bp, I)

    # Packed-gate weights; recurrent/fc weights row-padded to G so the kernel
    # can feed the full lane-dense carry straight into the MXU.
    w_ih_p = jnp.zeros((I, G), f32).at[:, :4 * H].set(
        jnp.transpose(w_ih).astype(f32))
    w_hh_p = jnp.zeros((G, G), f32).at[:H, :4 * H].set(
        jnp.transpose(w_hh).astype(f32))
    b_p = jnp.zeros((1, G), f32).at[:, :4 * H].set(
        (b_ih + b_hh).astype(f32).reshape(1, 4 * H))
    w_fc_p = jnp.zeros((G, Op), f32).at[:H, :O].set(
        jnp.transpose(w_fc).astype(f32))
    b_fc_p = jnp.zeros((1, Op), f32).at[:, :O].set(
        b_fc.astype(f32).reshape(1, O))

    # VMEM footprint -> explicit scoped limit (v5e default is only 16 MiB).
    vmem_bytes = (
        2 * (t_chunk * Bp * I) * 4            # x chunk (double-buffered)
        + (t_chunk * Bp * G) * 4              # xw scratch
        + 2 * (Bp * G) * 4                    # h, c carries
        + 2 * (I * G + G * G + G + G * Op + Op) * 4   # weights (dbl-buffered)
        + 2 * (Bp * Op) * 4)                  # out block
    vmem_limit = int(min(max(2 * vmem_bytes, 8 << 20), 48 << 20))

    kernel = functools.partial(
        lstm_fc_kernel, t_chunk=t_chunk, batch_pad=Bp, hidden=H,
        gate_width=G, seq_len=T, mask_tail=mask_tail, unroll=unroll)

    out_p = pl.pallas_call(
        kernel,
        out_shape=jax.ShapeDtypeStruct((Bp, Op), f32),
        grid_spec=pltpu.PrefetchScalarGridSpec(
            num_scalar_prefetch=0,
            grid=(num_chunks,),
            in_specs=[
                pl.BlockSpec((t_chunk * Bp, I), lambda c: (c, 0)),   # x chunk
                pl.BlockSpec((I, G), lambda c: (0, 0)),              # w_ih
                pl.BlockSpec((G, G), lambda c: (0, 0)),              # w_hh
                pl.BlockSpec((1, G), lambda c: (0, 0)),              # bias
                pl.BlockSpec((G, Op), lambda c: (0, 0)),             # w_fc
                pl.BlockSpec((1, Op), lambda c: (0, 0)),             # b_fc
            ],
            out_specs=pl.BlockSpec((Bp, Op), lambda c: (0, 0)),
            scratch_shapes=[
                pltpu.VMEM((t_chunk * Bp, G), f32),   # xW projection
                pltpu.VMEM((Bp, G), f32),             # h carry (lane-dense)
                pltpu.VMEM((Bp, G), f32),             # c carry (lane-dense)
            ]),
        compiler_params=pltpu.CompilerParams(
            dimension_semantics=("arbitrary",),       # sequential recurrence
            vmem_limit_bytes=vmem_limit),
    )(x_flat, w_ih_p, w_hh_p, b_p, w_fc_p, b_fc_p)

    return out_p[:B, :O]


def init_params(key, input_size, hidden_size, output_size):
    """Deterministic init mirroring PyTorch shapes (uniform +/- 1/sqrt(H))."""
    ks = jax.random.split(key, 6)
    k_lstm = 1.0 / jnp.sqrt(jnp.float32(hidden_size))
    k_fc = 1.0 / jnp.sqrt(jnp.float32(hidden_size))
    w_ih = jax.random.uniform(ks[0], (4 * hidden_size, input_size),
                              jnp.float32, -k_lstm, k_lstm)
    w_hh = jax.random.uniform(ks[1], (4 * hidden_size, hidden_size),
                              jnp.float32, -k_lstm, k_lstm)
    b_ih = jax.random.uniform(ks[2], (4 * hidden_size,),
                              jnp.float32, -k_lstm, k_lstm)
    b_hh = jax.random.uniform(ks[3], (4 * hidden_size,),
                              jnp.float32, -k_lstm, k_lstm)
    w_fc = jax.random.uniform(ks[4], (output_size, hidden_size),
                              jnp.float32, -k_fc, k_fc)
    b_fc = jax.random.uniform(ks[5], (output_size,),
                              jnp.float32, -k_fc, k_fc)
    return w_ih, w_hh, b_ih, b_hh, w_fc, b_fc


if __name__ == "__main__":
    # Small shapes consistent with the module: (batch, seq, input_size).
    B, T, I = 2, 8, 4
    H, O = 32, 16

    key = jax.random.PRNGKey(0)
    k_x, k_p = jax.random.split(key)
    x = jax.random.normal(k_x, (B, T, I), dtype=jnp.float32)
    params = init_params(k_p, I, H, O)

    out = rnn_forward(x, *params)
    out = jax.block_until_ready(out)
    assert out.shape == (B, O)

    # Pure-JAX reference (PyTorch LSTM gate order [i, f, g, o]).
    def ref_forward(x, w_ih, w_hh, b_ih, b_hh, w_fc, b_fc):
        Bh = x.shape[0]
        h = jnp.zeros((Bh, H), jnp.float32)
        c = jnp.zeros((Bh, H), jnp.float32)
        for t in range(x.shape[1]):
            g = x[:, t, :] @ w_ih.T + b_ih + h @ w_hh.T + b_hh
            i_g = jax.nn.sigmoid(g[:, 0 * H:1 * H])
            f_g = jax.nn.sigmoid(g[:, 1 * H:2 * H])
            g_g = jnp.tanh(g[:, 2 * H:3 * H])
            o_g = jax.nn.sigmoid(g[:, 3 * H:4 * H])
            c = f_g * c + i_g * g_g
            h = o_g * jnp.tanh(c)
        return h @ w_fc.T + b_fc

    ref = ref_forward(x, *params)
    # Tolerance loosened vs. the f32-only version: MXU operands are bf16
    # (f32 accumulation), per the performance review.
    assert jnp.allclose(out, ref, atol=2e-2, rtol=2e-2)

    print("KERNEL_OK")
</pallas_src>

<mosaic_0001>
module attributes {stable_mosaic.version = 11 : i64} {
  func.func @lstm_fc_kernel(%arg0: i32, %arg1: memref<64x4xf32, #tpu.memory_space<vmem>>, %arg2: memref<4x128xf32, #tpu.memory_space<vmem>>, %arg3: memref<128x128xf32, #tpu.memory_space<vmem>>, %arg4: memref<1x128xf32, #tpu.memory_space<vmem>>, %arg5: memref<128x128xf32, #tpu.memory_space<vmem>>, %arg6: memref<1x128xf32, #tpu.memory_space<vmem>>, %arg7: memref<8x128xf32, #tpu.memory_space<vmem>>, %arg8: memref<64x128xf32, #tpu.memory_space<vmem>>, %arg9: memref<8x128xf32, #tpu.memory_space<vmem>>, %arg10: memref<8x128xf32, #tpu.memory_space<vmem>>) attributes {dimension_semantics = [#tpu.dimension_semantics<arbitrary>], iteration_bounds = array<i64: 1>, scalar_prefetch = 0 : i64, scratch_operands = 3 : i64, tpu.core_type = #tpu.core_type<tc>, window_params = [{transform_indices = @transform_0, window_bounds = array<i64: 64, 4>}, {pipeline_mode = #tpu.pipeline_mode<synchronous>, transform_indices = @transform_1, window_bounds = array<i64: 4, 128>}, {pipeline_mode = #tpu.pipeline_mode<synchronous>, transform_indices = @transform_2, window_bounds = array<i64: 128, 128>}, {pipeline_mode = #tpu.pipeline_mode<synchronous>, transform_indices = @transform_3, window_bounds = array<i64: 1, 128>}, {pipeline_mode = #tpu.pipeline_mode<synchronous>, transform_indices = @transform_4, window_bounds = array<i64: 128, 128>}, {pipeline_mode = #tpu.pipeline_mode<synchronous>, transform_indices = @transform_5, window_bounds = array<i64: 1, 128>}, {pipeline_mode = #tpu.pipeline_mode<synchronous>, transform_indices = @transform_6, window_bounds = array<i64: 8, 128>}]} {
    %c0_i32 = arith.constant 0 : i32
    %0 = arith.cmpi eq, %arg0, %c0_i32 : i32
    %1 = arith.extui %0 : i1 to i32
    %c0_i32_0 = arith.constant 0 : i32
    %2 = arith.cmpi ne, %1, %c0_i32_0 : i32
    scf.if %2 {
      %cst_74 = arith.constant 0.000000e+00 : f32
      %189 = vector.broadcast %cst_74 : f32 to vector<8x128xf32>
      %c0_75 = arith.constant 0 : index
      %c0_76 = arith.constant 0 : index
      %190 = vector.load %arg9[%c0_75, %c0_76] : memref<8x128xf32, #tpu.memory_space<vmem>>, vector<8x128xf32>
      tpu.vector_store %arg9[%c0_75, %c0_76], %189 {strides = array<i32>} : memref<8x128xf32, #tpu.memory_space<vmem>>, vector<8x128xf32>,
      %cst_77 = arith.constant 0.000000e+00 : f32
      %191 = vector.broadcast %cst_77 : f32 to vector<8x128xf32>
      %c0_78 = arith.constant 0 : index
      %c0_79 = arith.constant 0 : index
      %192 = vector.load %arg10[%c0_78, %c0_79] : memref<8x128xf32, #tpu.memory_space<vmem>>, vector<8x128xf32>
      tpu.vector_store %arg10[%c0_78, %c0_79], %191 {strides = array<i32>} : memref<8x128xf32, #tpu.memory_space<vmem>>, vector<8x128xf32>,
    } else {
    }
    %c0 = arith.constant 0 : index
    %c0_1 = arith.constant 0 : index
    %3 = vector.load %arg1[%c0, %c0_1] : memref<64x4xf32, #tpu.memory_space<vmem>>, vector<64x4xf32>
    %4 = arith.truncf %3 : vector<64x4xf32> to vector<64x4xbf16>
    %c0_2 = arith.constant 0 : index
    %c0_3 = arith.constant 0 : index
    %5 = vector.load %arg2[%c0_2, %c0_3] : memref<4x128xf32, #tpu.memory_space<vmem>>, vector<4x128xf32>
    %6 = arith.truncf %5 : vector<4x128xf32> to vector<4x128xbf16>
    %cst = arith.constant dense<0.000000e+00> : vector<64x128xf32>
    %7 = tpu.matmul %4, %6, %cst {dimension_numbers = #tpu.dot_dimension_numbers<[1], [0], [0], [1], [0, 0, 1, 1], [], []>} : vector<64x4xbf16>, vector<4x128xbf16>, vector<64x128xf32> -> vector<64x128xf32>
    %c0_4 = arith.constant 0 : index
    %c0_5 = arith.constant 0 : index
    %8 = vector.load %arg4[%c0_4, %c0_5] : memref<1x128xf32, #tpu.memory_space<vmem>>, vector<1x128xf32>
    %9 = vector.broadcast %8 : vector<1x128xf32> to vector<64x128xf32>
    %10 = arith.addf %7, %9 : vector<64x128xf32>
    %c0_6 = arith.constant 0 : index
    %c0_7 = arith.constant 0 : index
    %11 = vector.load %arg8[%c0_6, %c0_7] : memref<64x128xf32, #tpu.memory_space<vmem>>, vector<64x128xf32>
    tpu.vector_store %arg8[%c0_6, %c0_7], %10 {strides = array<i32>} : memref<64x128xf32, #tpu.memory_space<vmem>>, vector<64x128xf32>,
    %c0_8 = arith.constant 0 : index
    %c0_9 = arith.constant 0 : index
    %12 = vector.load %arg3[%c0_8, %c0_9] : memref<128x128xf32, #tpu.memory_space<vmem>>, vector<128x128xf32>
    %13 = arith.truncf %12 : vector<128x128xf32> to vector<128x128xbf16>
    %c0_10 = arith.constant 0 : index
    %c0_11 = arith.constant 0 : index
    %14 = vector.load %arg9[%c0_10, %c0_11] : memref<8x128xf32, #tpu.memory_space<vmem>>, vector<8x128xf32>
    %c0_12 = arith.constant 0 : index
    %c0_13 = arith.constant 0 : index
    %15 = vector.load %arg10[%c0_12, %c0_13] : memref<8x128xf32, #tpu.memory_space<vmem>>, vector<8x128xf32>
    %c0_i32_14 = arith.constant 0 : i32
    %c8_i32 = arith.constant 8 : i32
    %16 = arith.muli %c0_i32_14, %c8_i32 : i32
    %17 = tpu.assume_multiple %16, 8 : i32
    %18 = arith.index_cast %17 : i32 to index
    %c0_15 = arith.constant 0 : index
    %19 = vector.load %arg8[%18, %c0_15] : memref<64x128xf32, #tpu.memory_space<vmem>>, vector<8x128xf32>
    %20 = arith.truncf %14 : vector<8x128xf32> to vector<8x128xbf16>
    %cst_16 = arith.constant dense<0.000000e+00> : vector<8x128xf32>
    %21 = tpu.matmul %20, %13, %cst_16 {dimension_numbers = #tpu.dot_dimension_numbers<[1], [0], [0], [1], [0, 0, 1, 1], [], []>} : vector<8x128xbf16>, vector<128x128xbf16>, vector<8x128xf32> -> vector<8x128xf32>
    %22 = arith.addf %19, %21 : vector<8x128xf32>
    %23 = arith.negf %22 : vector<8x128xf32>
    %24 = math.exp %23 : vector<8x128xf32>
    %cst_17 = arith.constant 1.000000e+00 : f32
    %25 = vector.broadcast %cst_17 : f32 to vector<8x128xf32>
    %26 = arith.addf %25, %24 : vector<8x128xf32>
    %27 = arith.divf %25, %26 : vector<8x128xf32>
    %28 = math.tanh %22 : vector<8x128xf32>
    %c96_i32 = arith.constant 96 : i32
    %29 = tpu.dynamic_rotate %27 by %c96_i32 dim 1 : vector<8x128xf32>, i32 -> vector<8x128xf32>
    %c64_i32 = arith.constant 64 : i32
    %30 = tpu.dynamic_rotate %28 by %c64_i32 dim 1 : vector<8x128xf32>, i32 -> vector<8x128xf32>
    %c32_i32 = arith.constant 32 : i32
    %31 = tpu.dynamic_rotate %27 by %c32_i32 dim 1 : vector<8x128xf32>, i32 -> vector<8x128xf32>
    %32 = arith.mulf %29, %15 : vector<8x128xf32>
    %33 = arith.mulf %27, %30 : vector<8x128xf32>
    %34 = arith.addf %32, %33 : vector<8x128xf32>
    %35 = math.tanh %34 : vector<8x128xf32>
    %36 = arith.mulf %31, %35 : vector<8x128xf32>
    %c1_i32 = arith.constant 1 : i32
    %c8_i32_18 = arith.constant 8 : i32
    %37 = arith.muli %c1_i32, %c8_i32_18 : i32
    %38 = tpu.assume_multiple %37, 8 : i32
    %39 = arith.index_cast %38 : i32 to index
    %c0_19 = arith.constant 0 : index
    %40 = vector.load %arg8[%39, %c0_19] : memref<64x128xf32, #tpu.memory_space<vmem>>, vector<8x128xf32>
    %41 = arith.truncf %36 : vector<8x128xf32> to vector<8x128xbf16>
    %cst_20 = arith.constant dense<0.000000e+00> : vector<8x128xf32>
    %42 = tpu.matmul %41, %13, %cst_20 {dimension_numbers = #tpu.dot_dimension_numbers<[1], [0], [0], [1], [0, 0, 1, 1], [], []>} : vector<8x128xbf16>, vector<128x128xbf16>, vector<8x128xf32> -> vector<8x128xf32>
    %43 = arith.addf %40, %42 : vector<8x128xf32>
    %44 = arith.negf %43 : vector<8x128xf32>
    %45 = math.exp %44 : vector<8x128xf32>
    %cst_21 = arith.constant 1.000000e+00 : f32
    %46 = vector.broadcast %cst_21 : f32 to vector<8x128xf32>
    %47 = arith.addf %46, %45 : vector<8x128xf32>
    %48 = arith.divf %46, %47 : vector<8x128xf32>
    %49 = math.tanh %43 : vector<8x128xf32>
    %c96_i32_22 = arith.constant 96 : i32
    %50 = tpu.dynamic_rotate %48 by %c96_i32_22 dim 1 : vector<8x128xf32>, i32 -> vector<8x128xf32>
    %c64_i32_23 = arith.constant 64 : i32
    %51 = tpu.dynamic_rotate %49 by %c64_i32_23 dim 1 : vector<8x128xf32>, i32 -> vector<8x128xf32>
    %c32_i32_24 = arith.constant 32 : i32
    %52 = tpu.dynamic_rotate %48 by %c32_i32_24 dim 1 : vector<8x128xf32>, i32 -> vector<8x128xf32>
    %53 = arith.mulf %50, %34 : vector<8x128xf32>
    %54 = arith.mulf %48, %51 : vector<8x128xf32>
    %55 = arith.addf %53, %54 : vector<8x128xf32>
    %56 = math.tanh %55 : vector<8x128xf32>
    %57 = arith.mulf %52, %56 : vector<8x128xf32>
    %c2_i32 = arith.constant 2 : i32
    %c8_i32_25 = arith.constant 8 : i32
    %58 = arith.muli %c2_i32, %c8_i32_25 : i32
    %59 = tpu.assume_multiple %58, 8 : i32
    %60 = arith.index_cast %59 : i32 to index
    %c0_26 = arith.constant 0 : index
    %61 = vector.load %arg8[%60, %c0_26] : memref<64x128xf32, #tpu.memory_space<vmem>>, vector<8x128xf32>
    %62 = arith.truncf %57 : vector<8x128xf32> to vector<8x128xbf16>
    %cst_27 = arith.constant dense<0.000000e+00> : vector<8x128xf32>
    %63 = tpu.matmul %62, %13, %cst_27 {dimension_numbers = #tpu.dot_dimension_numbers<[1], [0], [0], [1], [0, 0, 1, 1], [], []>} : vector<8x128xbf16>, vector<128x128xbf16>, vector<8x128xf32> -> vector<8x128xf32>
    %64 = arith.addf %61, %63 : vector<8x128xf32>
    %65 = arith.negf %64 : vector<8x128xf32>
    %66 = math.exp %65 : vector<8x128xf32>
    %cst_28 = arith.constant 1.000000e+00 : f32
    %67 = vector.broadcast %cst_28 : f32 to vector<8x128xf32>
    %68 = arith.addf %67, %66 : vector<8x128xf32>
    %69 = arith.divf %67, %68 : vector<8x128xf32>
    %70 = math.tanh %64 : vector<8x128xf32>
    %c96_i32_29 = arith.constant 96 : i32
    %71 = tpu.dynamic_rotate %69 by %c96_i32_29 dim 1 : vector<8x128xf32>, i32 -> vector<8x128xf32>
    %c64_i32_30 = arith.constant 64 : i32
    %72 = tpu.dynamic_rotate %70 by %c64_i32_30 dim 1 : vector<8x128xf32>, i32 -> vector<8x128xf32>
    %c32_i32_31 = arith.constant 32 : i32
    %73 = tpu.dynamic_rotate %69 by %c32_i32_31 dim 1 : vector<8x128xf32>, i32 -> vector<8x128xf32>
    %74 = arith.mulf %71, %55 : vector<8x128xf32>
    %75 = arith.mulf %69, %72 : vector<8x128xf32>
    %76 = arith.addf %74, %75 : vector<8x128xf32>
    %77 = math.tanh %76 : vector<8x128xf32>
    %78 = arith.mulf %73, %77 : vector<8x128xf32>
    %c3_i32 = arith.constant 3 : i32
    %c8_i32_32 = arith.constant 8 : i32
    %79 = arith.muli %c3_i32, %c8_i32_32 : i32
    %80 = tpu.assume_multiple %79, 8 : i32
    %81 = arith.index_cast %80 : i32 to index
    %c0_33 = arith.constant 0 : index
    %82 = vector.load %arg8[%81, %c0_33] : memref<64x128xf32, #tpu.memory_space<vmem>>, vector<8x128xf32>
    %83 = arith.truncf %78 : vector<8x128xf32> to vector<8x128xbf16>
    %cst_34 = arith.constant dense<0.000000e+00> : vector<8x128xf32>
    %84 = tpu.matmul %83, %13, %cst_34 {dimension_numbers = #tpu.dot_dimension_numbers<[1], [0], [0], [1], [0, 0, 1, 1], [], []>} : vector<8x128xbf16>, vector<128x128xbf16>, vector<8x128xf32> -> vector<8x128xf32>
    %85 = arith.addf %82, %84 : vector<8x128xf32>
    %86 = arith.negf %85 : vector<8x128xf32>
    %87 = math.exp %86 : vector<8x128xf32>
    %cst_35 = arith.constant 1.000000e+00 : f32
    %88 = vector.broadcast %cst_35 : f32 to vector<8x128xf32>
    %89 = arith.addf %88, %87 : vector<8x128xf32>
    %90 = arith.divf %88, %89 : vector<8x128xf32>
    %91 = math.tanh %85 : vector<8x128xf32>
    %c96_i32_36 = arith.constant 96 : i32
    %92 = tpu.dynamic_rotate %90 by %c96_i32_36 dim 1 : vector<8x128xf32>, i32 -> vector<8x128xf32>
    %c64_i32_37 = arith.constant 64 : i32
    %93 = tpu.dynamic_rotate %91 by %c64_i32_37 dim 1 : vector<8x128xf32>, i32 -> vector<8x128xf32>
    %c32_i32_38 = arith.constant 32 : i32
    %94 = tpu.dynamic_rotate %90 by %c32_i32_38 dim 1 : vector<8x128xf32>, i32 -> vector<8x128xf32>
    %95 = arith.mulf %92, %76 : vector<8x128xf32>
    %96 = arith.mulf %90, %93 : vector<8x128xf32>
    %97 = arith.addf %95, %96 : vector<8x128xf32>
    %98 = math.tanh %97 : vector<8x128xf32>
    %99 = arith.mulf %94, %98 : vector<8x128xf32>
    %c4_i32 = arith.constant 4 : i32
    %c8_i32_39 = arith.constant 8 : i32
    %100 = arith.muli %c4_i32, %c8_i32_39 : i32
    %101 = tpu.assume_multiple %100, 8 : i32
    %102 = arith.index_cast %101 : i32 to index
    %c0_40 = arith.constant 0 : index
    %103 = vector.load %arg8[%102, %c0_40] : memref<64x128xf32, #tpu.memory_space<vmem>>, vector<8x128xf32>
    %104 = arith.truncf %99 : vector<8x128xf32> to vector<8x128xbf16>
    %cst_41 = arith.constant dense<0.000000e+00> : vector<8x128xf32>
    %105 = tpu.matmul %104, %13, %cst_41 {dimension_numbers = #tpu.dot_dimension_numbers<[1], [0], [0], [1], [0, 0, 1, 1], [], []>} : vector<8x128xbf16>, vector<128x128xbf16>, vector<8x128xf32> -> vector<8x128xf32>
    %106 = arith.addf %103, %105 : vector<8x128xf32>
    %107 = arith.negf %106 : vector<8x128xf32>
    %108 = math.exp %107 : vector<8x128xf32>
    %cst_42 = arith.constant 1.000000e+00 : f32
    %109 = vector.broadcast %cst_42 : f32 to vector<8x128xf32>
    %110 = arith.addf %109, %108 : vector<8x128xf32>
    %111 = arith.divf %109, %110 : vector<8x128xf32>
    %112 = math.tanh %106 : vector<8x128xf32>
    %c96_i32_43 = arith.constant 96 : i32
    %113 = tpu.dynamic_rotate %111 by %c96_i32_43 dim 1 : vector<8x128xf32>, i32 -> vector<8x128xf32>
    %c64_i32_44 = arith.constant 64 : i32
    %114 = tpu.dynamic_rotate %112 by %c64_i32_44 dim 1 : vector<8x128xf32>, i32 -> vector<8x128xf32>
    %c32_i32_45 = arith.constant 32 : i32
    %115 = tpu.dynamic_rotate %111 by %c32_i32_45 dim 1 : vector<8x128xf32>, i32 -> vector<8x128xf32>
    %116 = arith.mulf %113, %97 : vector<8x128xf32>
    %117 = arith.mulf %111, %114 : vector<8x128xf32>
    %118 = arith.addf %116, %117 : vector<8x128xf32>
    %119 = math.tanh %118 : vector<8x128xf32>
    %120 = arith.mulf %115, %119 : vector<8x128xf32>
    %c5_i32 = arith.constant 5 : i32
    %c8_i32_46 = arith.constant 8 : i32
    %121 = arith.muli %c5_i32, %c8_i32_46 : i32
    %122 = tpu.assume_multiple %121, 8 : i32
    %123 = arith.index_cast %122 : i32 to index
    %c0_47 = arith.constant 0 : index
    %124 = vector.load %arg8[%123, %c0_47] : memref<64x128xf32, #tpu.memory_space<vmem>>, vector<8x128xf32>
    %125 = arith.truncf %120 : vector<8x128xf32> to vector<8x128xbf16>
    %cst_48 = arith.constant dense<0.000000e+00> : vector<8x128xf32>
    %126 = tpu.matmul %125, %13, %cst_48 {dimension_numbers = #tpu.dot_dimension_numbers<[1], [0], [0], [1], [0, 0, 1, 1], [], []>} : vector<8x128xbf16>, vector<128x128xbf16>, vector<8x128xf32> -> vector<8x128xf32>
    %127 = arith.addf %124, %126 : vector<8x128xf32>
    %128 = arith.negf %127 : vector<8x128xf32>
    %129 = math.exp %128 : vector<8x128xf32>
    %cst_49 = arith.constant 1.000000e+00 : f32
    %130 = vector.broadcast %cst_49 : f32 to vector<8x128xf32>
    %131 = arith.addf %130, %129 : vector<8x128xf32>
    %132 = arith.divf %130, %131 : vector<8x128xf32>
    %133 = math.tanh %127 : vector<8x128xf32>
    %c96_i32_50 = arith.constant 96 : i32
    %134 = tpu.dynamic_rotate %132 by %c96_i32_50 dim 1 : vector<8x128xf32>, i32 -> vector<8x128xf32>
    %c64_i32_51 = arith.constant 64 : i32
    %135 = tpu.dynamic_rotate %133 by %c64_i32_51 dim 1 : vector<8x128xf32>, i32 -> vector<8x128xf32>
    %c32_i32_52 = arith.constant 32 : i32
    %136 = tpu.dynamic_rotate %132 by %c32_i32_52 dim 1 : vector<8x128xf32>, i32 -> vector<8x128xf32>
    %137 = arith.mulf %134, %118 : vector<8x128xf32>
    %138 = arith.mulf %132, %135 : vector<8x128xf32>
    %139 = arith.addf %137, %138 : vector<8x128xf32>
    %140 = math.tanh %139 : vector<8x128xf32>
    %141 = arith.mulf %136, %140 : vector<8x128xf32>
    %c6_i32 = arith.constant 6 : i32
    %c8_i32_53 = arith.constant 8 : i32
    %142 = arith.muli %c6_i32, %c8_i32_53 : i32
    %143 = tpu.assume_multiple %142, 8 : i32
    %144 = arith.index_cast %143 : i32 to index
    %c0_54 = arith.constant 0 : index
    %145 = vector.load %arg8[%144, %c0_54] : memref<64x128xf32, #tpu.memory_space<vmem>>, vector<8x128xf32>
    %146 = arith.truncf %141 : vector<8x128xf32> to vector<8x128xbf16>
    %cst_55 = arith.constant dense<0.000000e+00> : vector<8x128xf32>
    %147 = tpu.matmul %146, %13, %cst_55 {dimension_numbers = #tpu.dot_dimension_numbers<[1], [0], [0], [1], [0, 0, 1, 1], [], []>} : vector<8x128xbf16>, vector<128x128xbf16>, vector<8x128xf32> -> vector<8x128xf32>
    %148 = arith.addf %145, %147 : vector<8x128xf32>
    %149 = arith.negf %148 : vector<8x128xf32>
    %150 = math.exp %149 : vector<8x128xf32>
    %cst_56 = arith.constant 1.000000e+00 : f32
    %151 = vector.broadcast %cst_56 : f32 to vector<8x128xf32>
    %152 = arith.addf %151, %150 : vector<8x128xf32>
    %153 = arith.divf %151, %152 : vector<8x128xf32>
    %154 = math.tanh %148 : vector<8x128xf32>
    %c96_i32_57 = arith.constant 96 : i32
    %155 = tpu.dynamic_rotate %153 by %c96_i32_57 dim 1 : vector<8x128xf32>, i32 -> vector<8x128xf32>
    %c64_i32_58 = arith.constant 64 : i32
    %156 = tpu.dynamic_rotate %154 by %c64_i32_58 dim 1 : vector<8x128xf32>, i32 -> vector<8x128xf32>
    %c32_i32_59 = arith.constant 32 : i32
    %157 = tpu.dynamic_rotate %153 by %c32_i32_59 dim 1 : vector<8x128xf32>, i32 -> vector<8x128xf32>
    %158 = arith.mulf %155, %139 : vector<8x128xf32>
    %159 = arith.mulf %153, %156 : vector<8x128xf32>
    %160 = arith.addf %158, %159 : vector<8x128xf32>
    %161 = math.tanh %160 : vector<8x128xf32>
    %162 = arith.mulf %157, %161 : vector<8x128xf32>
    %c7_i32 = arith.constant 7 : i32
    %c8_i32_60 = arith.constant 8 : i32
    %163 = arith.muli %c7_i32, %c8_i32_60 : i32
    %164 = tpu.assume_multiple %163, 8 : i32
    %165 = arith.index_cast %164 : i32 to index
    %c0_61 = arith.constant 0 : index
    %166 = vector.load %arg8[%165, %c0_61] : memref<64x128xf32, #tpu.memory_space<vmem>>, vector<8x128xf32>
    %167 = arith.truncf %162 : vector<8x128xf32> to vector<8x128xbf16>
    %cst_62 = arith.constant dense<0.000000e+00> : vector<8x128xf32>
    %168 = tpu.matmul %167, %13, %cst_62 {dimension_numbers = #tpu.dot_dimension_numbers<[1], [0], [0], [1], [0, 0, 1, 1], [], []>} : vector<8x128xbf16>, vector<128x128xbf16>, vector<8x128xf32> -> vector<8x128xf32>
    %169 = arith.addf %166, %168 : vector<8x128xf32>
    %170 = arith.negf %169 : vector<8x128xf32>
    %171 = math.exp %170 : vector<8x128xf32>
    %cst_63 = arith.constant 1.000000e+00 : f32
    %172 = vector.broadcast %cst_63 : f32 to vector<8x128xf32>
    %173 = arith.addf %172, %171 : vector<8x128xf32>
    %174 = arith.divf %172, %173 : vector<8x128xf32>
    %175 = math.tanh %169 : vector<8x128xf32>
    %c96_i32_64 = arith.constant 96 : i32
    %176 = tpu.dynamic_rotate %174 by %c96_i32_64 dim 1 : vector<8x128xf32>, i32 -> vector<8x128xf32>
    %c64_i32_65 = arith.constant 64 : i32
    %177 = tpu.dynamic_rotate %175 by %c64_i32_65 dim 1 : vector<8x128xf32>, i32 -> vector<8x128xf32>
    %c32_i32_66 = arith.constant 32 : i32
    %178 = tpu.dynamic_rotate %174 by %c32_i32_66 dim 1 : vector<8x128xf32>, i32 -> vector<8x128xf32>
    %179 = arith.mulf %176, %160 : vector<8x128xf32>
    %180 = arith.mulf %174, %177 : vector<8x128xf32>
    %181 = arith.addf %179, %180 : vector<8x128xf32>
    %182 = math.tanh %181 : vector<8x128xf32>
    %183 = arith.mulf %178, %182 : vector<8x128xf32>
    %c8_i32_67 = arith.constant 8 : i32
    %c0_68 = arith.constant 0 : index
    %c0_69 = arith.constant 0 : index
    %184 = vector.load %arg9[%c0_68, %c0_69] : memref<8x128xf32, #tpu.memory_space<vmem>>, vector<8x128xf32>
    tpu.vector_store %arg9[%c0_68, %c0_69], %183 {strides = array<i32>} : memref<8x128xf32, #tpu.memory_space<vmem>>, vector<8x128xf32>,
    %c0_70 = arith.constant 0 : index
    %c0_71 = arith.constant 0 : index
    %185 = vector.load %arg10[%c0_70, %c0_71] : memref<8x128xf32, #tpu.memory_space<vmem>>, vector<8x128xf32>
    tpu.vector_store %arg10[%c0_70, %c0_71], %181 {strides = array<i32>} : memref<8x128xf32, #tpu.memory_space<vmem>>, vector<8x128xf32>,
    %c0_i32_72 = arith.constant 0 : i32
    %186 = arith.cmpi eq, %arg0, %c0_i32_72 : i32
    %187 = arith.extui %186 : i1 to i32
    %c0_i32_73 = arith.constant 0 : i32
    %188 = arith.cmpi ne, %187, %c0_i32_73 : i32
    scf.if %188 {
      %c0_74 = arith.constant 0 : index
      %c0_75 = arith.constant 0 : index
      %189 = vector.load %arg5[%c0_74, %c0_75] : memref<128x128xf32, #tpu.memory_space<vmem>>, vector<128x128xf32>
      %cst_76 = arith.constant dense<0.000000e+00> : vector<8x128xf32>
      %190 = tpu.matmul %183, %189, %cst_76 {dimension_numbers = #tpu.dot_dimension_numbers<[1], [0], [0], [1], [0, 0, 1, 1], [], []>} : vector<8x128xf32>, vector<128x128xf32>, vector<8x128xf32> -> vector<8x128xf32>
      %c0_77 = arith.constant 0 : index
      %c0_78 = arith.constant 0 : index
      %191 = vector.load %arg6[%c0_77, %c0_78] : memref<1x128xf32, #tpu.memory_space<vmem>>, vector<1x128xf32>
      %192 = vector.broadcast %191 : vector<1x128xf32> to vector<8x128xf32>
      %193 = arith.addf %190, %192 : vector<8x128xf32>
      %c0_79 = arith.constant 0 : index
      %c0_80 = arith.constant 0 : index
      %194 = vector.load %arg7[%c0_79, %c0_80] : memref<8x128xf32, #tpu.memory_space<vmem>>, vector<8x128xf32>
      tpu.vector_store %arg7[%c0_79, %c0_80], %193 {strides = array<i32>} : memref<8x128xf32, #tpu.memory_space<vmem>>, vector<8x128xf32>,
    } else {
    }
    return
  }
  func.func @transform_0(%arg0: i32) -> (i32, i32) {
    %c0_i32 = arith.constant 0 : i32
    %c0_i32_0 = arith.constant 0 : i32
    return %arg0, %c0_i32 : i32, i32
  }
  func.func @transform_1(%arg0: i32) -> (i32, i32) {
    %c0_i32 = arith.constant 0 : i32
    %c0_i32_0 = arith.constant 0 : i32
    %c0_i32_1 = arith.constant 0 : i32
    return %c0_i32, %c0_i32_0 : i32, i32
  }
  func.func @transform_2(%arg0: i32) -> (i32, i32) {
    %c0_i32 = arith.constant 0 : i32
    %c0_i32_0 = arith.constant 0 : i32
    %c0_i32_1 = arith.constant 0 : i32
    return %c0_i32, %c0_i32_0 : i32, i32
  }
  func.func @transform_3(%arg0: i32) -> (i32, i32) {
    %c0_i32 = arith.constant 0 : i32
    %c0_i32_0 = arith.constant 0 : i32
    %c0_i32_1 = arith.constant 0 : i32
    return %c0_i32, %c0_i32_0 : i32, i32
  }
  func.func @transform_4(%arg0: i32) -> (i32, i32) {
    %c0_i32 = arith.constant 0 : i32
    %c0_i32_0 = arith.constant 0 : i32
    %c0_i32_1 = arith.constant 0 : i32
    return %c0_i32, %c0_i32_0 : i32, i32
  }
  func.func @transform_5(%arg0: i32) -> (i32, i32) {
    %c0_i32 = arith.constant 0 : i32
    %c0_i32_0 = arith.constant 0 : i32
    %c0_i32_1 = arith.constant 0 : i32
    return %c0_i32, %c0_i32_0 : i32, i32
  }
  func.func @transform_6(%arg0: i32) -> (i32, i32) {
    %c0_i32 = arith.constant 0 : i32
    %c0_i32_0 = arith.constant 0 : i32
    %c0_i32_1 = arith.constant 0 : i32
    return %c0_i32, %c0_i32_0 : i32, i32
  }
}

</mosaic_0001>

<bundles_post_ra>
// kernel: tpu_custom_call.1
= control target key start
LH: loop header
LB: loop body
LE: loop exit
PB: predicated region body
PF: predicated region fallthrough
CT: control target
= control target key end

     0   :  { %11 = vsyncpa [#allocation6], 0  ;;  %s1587_s0 = inlined_call_operand.vmem [shape: f32[64,4], index: 0, kind: input, shape index: {}]   ;;  %s1588_s1 = inlined_call_operand.vmem [shape: f32[4,128], index: 1, kind: input, shape index: {}]   ;;  %s1589_s2 = inlined_call_operand.hbm [shape: f32[128,128], index: 2, kind: input, shape index: {}]   ;;  %s1590_s3 = inlined_call_operand.vmem [shape: f32[1,128], index: 3, kind: input, shape index: {}]   ;;  %s1591_s4 = inlined_call_operand.hbm [shape: f32[128,128], index: 4, kind: input, shape index: {}]   ;;  %s1592_s5 = inlined_call_operand.vmem [shape: f32[1,128], index: 5, kind: input, shape index: {}]   ;;  %s1593_s6 = inlined_call_operand.hbm [shape: f32[8,128], index: 6, kind: output, shape index: {}]  }
   0x1   :  { %12 = vsyncpa [#allocation9], 0 }
   0x2   :  { %13 = vsyncpa [#allocation7], 0  ;;  %s1261_s21 = smov [#allocation5]  }
   0x3   :  { %s23_s22 = sshll.u32 %s1261_s21, 4  ;;  %s24_s22 = int_to_ptr.vmem [resolvable:$true] %s23_s22 }
   0x4   :  { %s1203_s23 = scalar_lea.vmem %s24_s22, 2048  ;;  %p1208_p1 = scmp.lt.s32.totalorder %s24_s22, %s24_s22 }
   0x5   :  { %p1204_p0 = scmp.ne.s32.totalorder %s24_s22, %s1203_s23  ;;  %p1209_p2 = scmp.lt.s32.totalorder %s1203_s23, %s1203_s23 }
   0x7   :  { %p1210_p3 = por %p1209_p2, %p1208_p1 }
   0x9   :  { %p1211_p4 = pnand %p1210_p3, %p1204_p0 }
   0xb   :  { %1214 = shalt.err (!%p1211_p4)
}
   0xc   :  { %s1262_s24 = smov 128   ;;  %s1263_s25 = smov 8  }
   0xd   :  { %29 = dma.hbm_to_vmem [thread:$0]  %s1589_s2, 2048, %s24_s22, [#allocation6], %s1262_s24, %s1262_s24, %s1263_s25  }
   0xe   :  { %s1264_s28 = smov [#allocation8]  }
   0xf   :  { %s37_s29 = sshll.u32 %s1264_s28, 4  ;;  %s38_s29 = int_to_ptr.vmem [resolvable:$true] %s37_s29 }
  0x10   :  { %s1223_s30 = scalar_lea.vmem %s38_s29, 2048  ;;  %p1228_p6 = scmp.lt.s32.totalorder %s38_s29, %s38_s29 }
  0x11   :  { %p1224_p5 = scmp.ne.s32.totalorder %s38_s29, %s1223_s30  ;;  %p1229_p7 = scmp.lt.s32.totalorder %s1223_s30, %s1223_s30 }
  0x13   :  { %p1230_p8 = por %p1229_p7, %p1228_p6 }
  0x15   :  { %p1231_p9 = pnand %p1230_p8, %p1224_p5 }
  0x17   :  { %1234 = shalt.err (!%p1231_p9)
}
  0x18   :  { %43 = dma.hbm_to_vmem [thread:$0]  %s1591_s4, 2048, %s38_s29, [#allocation9], %s1262_s24, %s1262_s24, %s1263_s25  }
  0x19   :  { %1255 = dma.done.wait [#allocation6], 2048  }
  0x1a   :  { %1256 = vsyncadd [#allocation6], 4294965248 }
  0x1b   :  { %1257 = dma.done.wait [#allocation9], 2048  }
  0x1c   :  { %1258 = vsyncadd [#allocation9], 4294965248  ;;  %v1265_v0 = vmov 0.0   ;;  %vm1266_vm0 = vmmov 0   ;;  %v184_v1 = vld [vmem:[#allocation5 + $0x70] sm:$0xff]  ;;  %v185_v2 = vld [vmem:[#allocation5 + $0x78] sm:$0xff] }
  0x1d   :  { %924 = vmatprep.subr.bf16.mxu1 %v1265_v0  ;;  %940 = vmatprep.mubr.msk.bf16.mxu1 %vm1266_vm0, %v1265_v0  ;;  %v182_v3 = vld [vmem:[#allocation5 + $0x60] sm:$0xff]  ;;  %v1316_v4 = vpack.c.bf16 %v185_v2, %v184_v1  ;;  %v183_v5 = vld [vmem:[#allocation5 + $0x68] sm:$0xff]  ;;  %vm93_vm1 = vcmask 1041408   ;;  %v180_v9 = vld [vmem:[#allocation5 + $0x50] sm:$0xff]  ;;  %vm80_vm2 = vcmask 31744   ;;  %v1267_v34 = vmov 0.0|0.0  }
  0x1e   :  { %v1319_v6 = vpack.c.bf16 %v183_v5, %v182_v3  ;;  %v71_v7 = vld [vmem:[%s1588_s1] sm:$0xf]  ;;  %v181_v10 = vld [vmem:[#allocation5 + $0x58] sm:$0xff]  ;;  %v60_v12 = vld [vmem:[%s1587_s0 + $0x8] sm:$0xff]  ;;  %s1268_s25 = smov 32   ;;  %s1269_s26 = smov 96  }
  0x1f   :  { %925 = vmatpush3.bf16.msra.mxu1 %v1316_v4  ;;  %v59_v8 = vld [vmem:[%s1587_s0] sm:$0xff]  ;;  %v72_v11 = vpack.c.bf16 %v71_v7, %v71_v7  ;;  %v61_v14 = vld [vmem:[%s1587_s0 + $0x10] sm:$0xff]  ;;  %v62_v15 = vld [vmem:[%s1587_s0 + $0x18] sm:$0xff]  ;;  %v1338_v18 = vpack.c.bf16 %v181_v10, %v180_v9  ;;  %s1270_s27 = smov 64   ;;  %s1271_s29 = smov [#allocation10]  }
  0x20   :  { %926 = vmatprep.subr.bf16.mxu1 %v1265_v0  ;;  %v67_v13 = vpack.c.bf16 %v60_v12, %v59_v8  ;;  %v68_v17 = vpack.c.bf16 %v62_v15, %v61_v14  ;;  %v178_v19 = vld [vmem:[#allocation5 + $0x40] sm:$0xff]  ;;  %v179_v20 = vld [vmem:[#allocation5 + $0x48] sm:$0xff]  ;;  %v176_v22 = vld [vmem:[#allocation5 + $0x30] sm:$0xff]  ;;  %s796_s30 = sshll.u32 %s1271_s29, 4  ;;  %s797_s30 = int_to_ptr.vmem [resolvable:$true] %s796_s30 }
  0x21   :  { %1119 = vmatprep.subr.msk.bf16.mxu0 %vm93_vm1, %v72_v11  ;;  %v95_v16 = vsel %vm93_vm1, %v72_v11, 0  ;;  %v1345_v21 = vpack.c.bf16 %v179_v20, %v178_v19  ;;  %v177_v23 = vld [vmem:[#allocation5 + $0x38] sm:$0xff]  ;;  %v174_v25 = vld [vmem:[#allocation5 + $0x20] sm:$0xff]  ;;  %v175_v26 = vld [vmem:[#allocation5 + $0x28] sm:$0xff]  ;;  %s1235_s7 = scalar_lea.vmem %s797_s30, 128  ;;  %p1240_p11 = scmp.lt.s32.totalorder %s797_s30, %s797_s30 }
  0x22   :  { %915 = vmatpush3.bf16.msra.mxu0 %v95_v16  ;;  %916 = vmatprep.mubr.msk.bf16.mxu0 %vm80_vm2, %v67_v13  ;;  %v1351_v24 = vpack.c.bf16 %v177_v23, %v176_v22  ;;  %v1357_v27 = vpack.c.bf16 %v175_v26, %v174_v25  ;;  %v172_v28 = vld [vmem:[#allocation5 + $0x10] sm:$0xff]  ;;  %v173_v29 = vld [vmem:[#allocation5 + $0x18] sm:$0xff]  ;;  %v170_v31 = vld [vmem:[#allocation5] sm:$0xff]  ;;  %p1236_p10 = scmp.ne.s32.totalorder %s797_s30, %s1235_s7  ;;  %p1241_p12 = scmp.lt.s32.totalorder %s1235_s7, %s1235_s7 }
  0x23   :  { %927 = vmatpush3.bf16.msra.mxu1 %v1319_v6  ;;  %944 = vmatprep.subr.bf16.mxu0 %v1265_v0  ;;  %v1363_v30 = vpack.c.bf16 %v173_v29, %v172_v28  ;;  %v171_v32 = vld [vmem:[#allocation5 + $0x8] sm:$0xff]  ;;  %v1405_v36 = vld [vmem:[%s1590_s3] ss:$0 sm:$0xff]  ;;  %v65_v49 = vld [vmem:[%s1587_s0 + $0x30] sm:$0xff] }
  0x24   :  { %928 = vmatprep.subr.bf16.mxu1 %v1265_v0  ;;  %v1369_v33 = vpack.c.bf16 %v171_v32, %v170_v31  ;;  %v63_v47 = vld [vmem:[%s1587_s0 + $0x20] sm:$0xff]  ;;  %v64_v48 = vld [vmem:[%s1587_s0 + $0x28] sm:$0xff]  ;;  %v66_v51 = vld [vmem:[%s1587_s0 + $0x38] sm:$0xff]  ;;  %p1242_p13 = por %p1241_p12, %p1240_p11 }
  0x25   :  { %917 = vmatmul.mubr.msk.bf16.vlgmr.msra.gmra.mxu0 %vm80_vm2, %v68_v17  ;;  %v69_v50 = vpack.c.bf16 %v64_v48, %v63_v47  ;;  %v70_v52 = vpack.c.bf16 %v66_v51, %v65_v49 }
  0x26   :  { %945 = vmatpush3.bf16.msra.mxu0 %v1316_v4  ;;  %p1243_p0 = pnand %p1242_p13, %p1236_p10 }
  0x27   :  { %929 = vmatpush3.bf16.msra.mxu1 %v1338_v18  ;;  %946 = vmatprep.subr.bf16.mxu0 %v1265_v0 }
  0x28   :  { %930 = vmatprep.subr.bf16.mxu1 %v1265_v0  ;;  %920 = vmatprep.mubr.msk.bf16.mxu0 %vm80_vm2, %v69_v50 }
  0x2a   :  { %947 = vmatpush3.bf16.msra.mxu0 %v1319_v6 }
  0x2b   :  { %931 = vmatpush3.bf16.msra.mxu1 %v1345_v21  ;;  %948 = vmatprep.subr.bf16.mxu0 %v1265_v0 }
  0x2c   :  { %932 = vmatprep.subr.bf16.mxu1 %v1265_v0 }
  0x2d   :  { %921 = vmatmul.mubr.msk.bf16.gmra.mxu0 %vm80_vm2, %v70_v52 }
  0x2e   :  { %949 = vmatpush3.bf16.msra.mxu0 %v1338_v18  ;;  %960 = vmatprep.mubr.msk.bf16.mxu0 %vm1266_vm0, %v1265_v0 }
  0x2f   :  { %933 = vmatpush3.bf16.msra.mxu1 %v1351_v24  ;;  %950 = vmatprep.subr.bf16.mxu0 %v1265_v0 }
  0x30   :  { %934 = vmatprep.subr.bf16.mxu1 %v1265_v0 }
  0x32   :  { %951 = vmatpush3.bf16.msra.mxu0 %v1345_v21 }
  0x33   :  { %935 = vmatpush3.bf16.msra.mxu1 %v1357_v27  ;;  %952 = vmatprep.subr.bf16.mxu0 %v1265_v0 }
  0x34   :  { %936 = vmatprep.subr.bf16.mxu1 %v1265_v0 }
  0x36   :  { %953 = vmatpush3.bf16.msra.mxu0 %v1351_v24 }
  0x37   :  { %937 = vmatpush3.bf16.msra.mxu1 %v1363_v30  ;;  %954 = vmatprep.subr.bf16.mxu0 %v1265_v0 }
  0x38   :  { %938 = vmatprep.subr.bf16.mxu1 %v1265_v0 }
  0x3a   :  { %955 = vmatpush3.bf16.msra.mxu0 %v1357_v27 }
  0x3b   :  { %939 = vmatpush3.bf16.msra.mxu1 %v1369_v33  ;;  %956 = vmatprep.subr.bf16.mxu0 %v1265_v0 }
  0x3c   :  { %964 = vmatprep.subr.bf16.mxu1 %v1265_v0 }
  0x3e   :  { %941 = vmatmul.mubr.bf16.vlgmr.msra.gmra.mxu1 %v1267_v34  ;;  %957 = vmatpush3.bf16.msra.mxu0 %v1363_v30 }
  0x3f   :  { %965 = vmatpush3.bf16.msra.mxu1 %v1316_v4  ;;  %958 = vmatprep.subr.bf16.mxu0 %v1265_v0 }
  0x40   :  { %966 = vmatprep.subr.bf16.mxu1 %v1265_v0  ;;  %980 = vmatprep.mubr.msk.bf16.mxu1 %vm1266_vm0, %v1265_v0 }
  0x42   :  { %959 = vmatpush3.bf16.msra.mxu0 %v1369_v33 }
  0x43   :  { %967 = vmatpush3.bf16.msra.mxu1 %v1319_v6  ;;  %984 = vmatprep.subr.bf16.mxu0 %v1265_v0 }
  0x44   :  { %968 = vmatprep.subr.bf16.mxu1 %v1265_v0 }
  0x47   :  { %969 = vmatpush3.bf16.msra.mxu1 %v1338_v18 }
  0x48   :  { %970 = vmatprep.subr.bf16.mxu1 %v1265_v0 }
  0x4b   :  { %971 = vmatpush3.bf16.msra.mxu1 %v1345_v21 }
  0x4c   :  { %972 = vmatprep.subr.bf16.mxu1 %v1265_v0 }
  0x4f   :  { %973 = vmatpush3.bf16.msra.mxu1 %v1351_v24 }
  0x50   :  { %974 = vmatprep.subr.bf16.mxu1 %v1265_v0 }
  0x53   :  { %975 = vmatpush3.bf16.msra.mxu1 %v1357_v27 }
  0x54   :  { %976 = vmatprep.subr.bf16.mxu1 %v1265_v0 }
  0x57   :  { %977 = vmatpush3.bf16.msra.mxu1 %v1363_v30 }
  0x58   :  { %978 = vmatprep.subr.bf16.mxu1 %v1265_v0 }
  0x5b   :  { %979 = vmatpush3.bf16.msra.mxu1 %v1369_v33 }
  0x5c   :  { %1004 = vmatprep.subr.bf16.mxu1 %v1265_v0 }
  0xe5   :  { %v1400_v35 = vpop.f32.mrf.mxu0 }
  0xe7   :  { %v131_v37 = vpop.f32.mrf.mxu0 }
  0xe8   :  { %v132_v38 = vadd.f32 %v1405_v36, %v131_v37  ;;  %v140_v37 = vadd.f32 %v1400_v35, %v1405_v36 }
  0xe9   :  { %v1445_v1 = vpop.f32.mrf.mxu0 }
  0xeb   :  { %v134_v2 = vpop.f32.mrf.mxu0 }
  0xec   :  { %v135_v9 = vadd.f32 %v1405_v36, %v134_v2 }
  0xed   :  { %v1447_v3 = vpop.f32.mrf.mxu0 }
  0xef   :  { %v1449_v5 = vpop.f32.mrf.mxu0 }
  0xf1   :  { %v1451_v7 = vpop.f32.mrf.mxu0 }
  0xf3   :  { %v1453_v8 = vpop.f32.mrf.mxu0 }
  0xfe   :  { %v232_v39 = vpop.f32.mrf.mxu1 }
  0xff   :  { %v238_v40 = vadd.f32 %v232_v39, %v132_v38 }
 0x100   :  { %v942_v41 = vpop.f32.mrf.mxu1 }
 0x101   :  { %v811_v42 = vmul.f32 -1.442695, %v238_v40 }
 0x102   :  { %v235_v43 = vpop.f32.mrf.mxu1 }
 0x103   :  { %1131 = vpow2.f32 %v811_v42 }
 0x104   :  { %v943_v44 = vpop.f32.mrf.mxu1 }
 0x110   :  { %v1132_v45 = vpop.eup %1131 }
 0x111   :  { %v242_v46 = vadd.f32 1.0, %v1132_v45 }
 0x113   :  { %1133 = vrcp.f32 %v242_v46 }
 0x114   :  { %1135 = vtanh.f32 %v238_v40 }
 0x120   :  { %v1134_v53 = vpop.eup %1133 }
 0x121   :  { %250 = vrot.lane.b32.xlu1 %v1134_v53, %s1268_s25  ;;  %246 = vrot.lane.b32.xlu0 %v1134_v53, %s1269_s26  ;;  %v1136_v54 = vpop.eup %1135 }
 0x125   :  { %248 = vrot.lane.b32.xlu0 %v1136_v54, %s1270_s27 }
 0x193   :  { %v247_v55 = vpop.permute.xlu0 %246  ;;  %v251_v61 = vpop.permute.xlu1 %250 }
 0x194   :  { %v252_v57 = vmul.f32 0.0, %v247_v55 }
 0x197   :  { %v249_v56 = vpop.permute.xlu0 %248 }
 0x198   :  { %v253_v58 = vmul.f32 %v1134_v53, %v249_v56  ;;  %v143_v56 = vadd.f32 %v1445_v1, %v1405_v36 }
 0x19a   :  { %v254_v59 = vadd.f32 %v253_v58, %v252_v57 }
 0x19c   :  { %1137 = vtanh.f32 %v254_v59 }
 0x1a9   :  { %v1138_v60 = vpop.eup %1137 }
 0x1aa   :  { %v256_v62 = vmul.f32 %v1138_v60, %v251_v61 }
 0x1ac   :  { %v259_v63 = vpack.c.bf16 %v256_v62, %v256_v62 }
 0x1ae   :  { %961 = vmatmul.mubr.bf16.vlgmr.msra.gmra.mxu0 %v259_v63 }
 0x1af   :  { %985 = vmatpush3.bf16.msra.mxu0 %v1316_v4  ;;  %1000 = vmatprep.mubr.msk.bf16.mxu0 %vm1266_vm0, %v1265_v0 }
 0x1b0   :  { %986 = vmatprep.subr.bf16.mxu0 %v1265_v0 }
 0x1b3   :  { %987 = vmatpush3.bf16.msra.mxu0 %v1319_v6 }
 0x1b4   :  { %988 = vmatprep.subr.bf16.mxu0 %v1265_v0 }
 0x1b7   :  { %989 = vmatpush3.bf16.msra.mxu0 %v1338_v18 }
 0x1b8   :  { %990 = vmatprep.subr.bf16.mxu0 %v1265_v0 }
 0x1bb   :  { %991 = vmatpush3.bf16.msra.mxu0 %v1345_v21 }
 0x1bc   :  { %992 = vmatprep.subr.bf16.mxu0 %v1265_v0 }
 0x1bf   :  { %993 = vmatpush3.bf16.msra.mxu0 %v1351_v24 }
 0x1c0   :  { %994 = vmatprep.subr.bf16.mxu0 %v1265_v0 }
 0x1c3   :  { %995 = vmatpush3.bf16.msra.mxu0 %v1357_v27 }
 0x1c4   :  { %996 = vmatprep.subr.bf16.mxu0 %v1265_v0 }
 0x1c7   :  { %997 = vmatpush3.bf16.msra.mxu0 %v1363_v30 }
 0x1c8   :  { %998 = vmatprep.subr.bf16.mxu0 %v1265_v0 }
 0x1cb   :  { %999 = vmatpush3.bf16.msra.mxu0 %v1369_v33 }
 0x1cc   :  { %1024 = vmatprep.subr.bf16.mxu0 %v1265_v0 }
 0x26e   :  { %v294_v10 = vpop.f32.mrf.mxu0 }
 0x26f   :  { %v300_v11 = vadd.f32 %v294_v10, %v135_v9 }
 0x270   :  { %v962_v12 = vpop.f32.mrf.mxu0 }
 0x271   :  { %v812_v13 = vmul.f32 -1.442695, %v300_v11  ;;  %1139 = vtanh.f32 %v300_v11 }
 0x272   :  { %v297_v14 = vpop.f32.mrf.mxu0 }
 0x273   :  { %1141 = vpow2.f32 %v812_v13 }
 0x274   :  { %v963_v15 = vpop.f32.mrf.mxu0 }
 0x27e   :  { %v1140_v16 = vpop.eup %1139 }
 0x27f   :  { %310 = vrot.lane.b32.xlu0 %v1140_v16, %s1270_s27 }
 0x280   :  { %v1142_v17 = vpop.eup %1141 }
 0x281   :  { %v304_v19 = vadd.f32 1.0, %v1142_v17 }
 0x283   :  { %1143 = vrcp.f32 %v304_v19 }
 0x290   :  { %v1144_v20 = vpop.eup %1143 }
 0x291   :  { %308 = vrot.lane.b32.xlu1 %v1144_v20, %s1269_s26 }
 0x295   :  { %312 = vrot.lane.b32.xlu1 %v1144_v20, %s1268_s25 }
 0x2f1   :  { %v311_v22 = vpop.permute.xlu0 %310 }
 0x2f2   :  { %v315_v25 = vmul.f32 %v1144_v20, %v311_v22  ;;  %v148_v20 = vadd.f32 %v1405_v36, %v1449_v5 }
 0x303   :  { %v309_v23 = vpop.permute.xlu1 %308 }
 0x304   :  { %v314_v26 = vmul.f32 %v309_v23, %v254_v59 }
 0x306   :  { %v316_v28 = vadd.f32 %v315_v25, %v314_v26 }
 0x307   :  { %v313_v31 = vpop.permute.xlu1 %312 }
 0x308   :  { %1145 = vtanh.f32 %v316_v28 }
 0x315   :  { %v1146_v29 = vpop.eup %1145 }
 0x316   :  { %v318_v32 = vmul.f32 %v1146_v29, %v313_v31 }
 0x318   :  { %v321_v34 = vpack.c.bf16 %v318_v32, %v318_v32 }
 0x31a   :  { %981 = vmatmul.mubr.bf16.vlgmr.msra.gmra.mxu1 %v321_v34 }
 0x31b   :  { %1005 = vmatpush3.bf16.msra.mxu1 %v1316_v4  ;;  %1020 = vmatprep.mubr.msk.bf16.mxu1 %vm1266_vm0, %v1265_v0 }
 0x31c   :  { %1006 = vmatprep.subr.bf16.mxu1 %v1265_v0 }
 0x31f   :  { %1007 = vmatpush3.bf16.msra.mxu1 %v1319_v6 }
 0x320   :  { %1008 = vmatprep.subr.bf16.mxu1 %v1265_v0 }
 0x323   :  { %1009 = vmatpush3.bf16.msra.mxu1 %v1338_v18 }
 0x324   :  { %1010 = vmatprep.subr.bf16.mxu1 %v1265_v0 }
 0x327   :  { %1011 = vmatpush3.bf16.msra.mxu1 %v1345_v21 }
 0x328   :  { %1012 = vmatprep.subr.bf16.mxu1 %v1265_v0 }
 0x32b   :  { %1013 = vmatpush3.bf16.msra.mxu1 %v1351_v24 }
 0x32c   :  { %1014 = vmatprep.subr.bf16.mxu1 %v1265_v0 }
 0x32f   :  { %1015 = vmatpush3.bf16.msra.mxu1 %v1357_v27 }
 0x330   :  { %1016 = vmatprep.subr.bf16.mxu1 %v1265_v0 }
 0x333   :  { %1017 = vmatpush3.bf16.msra.mxu1 %v1363_v30 }
 0x334   :  { %1018 = vmatprep.subr.bf16.mxu1 %v1265_v0 }
 0x337   :  { %1019 = vmatpush3.bf16.msra.mxu1 %v1369_v33 }
 0x338   :  { %1044 = vmatprep.subr.bf16.mxu1 %v1265_v0 }
 0x3da   :  { %v356_v38 = vpop.f32.mrf.mxu1 }
 0x3db   :  { %v362_v39 = vadd.f32 %v356_v38, %v140_v37 }
 0x3dc   :  { %v982_v40 = vpop.f32.mrf.mxu1 }
 0x3dd   :  { %v813_v41 = vmul.f32 -1.442695, %v362_v39  ;;  %1147 = vtanh.f32 %v362_v39 }
 0x3de   :  { %v359_v42 = vpop.f32.mrf.mxu1 }
 0x3df   :  { %1149 = vpow2.f32 %v813_v41 }
 0x3e0   :  { %v983_v43 = vpop.f32.mrf.mxu1 }
 0x3ea   :  { %v1148_v44 = vpop.eup %1147 }
 0x3eb   :  { %372 = vrot.lane.b32.xlu1 %v1148_v44, %s1270_s27 }
 0x3ec   :  { %v1150_v45 = vpop.eup %1149 }
 0x3ed   :  { %v366_v46 = vadd.f32 1.0, %v1150_v45 }
 0x3ef   :  { %1151 = vrcp.f32 %v366_v46 }
 0x3fc   :  { %v1152_v47 = vpop.eup %1151 }
 0x3fd   :  { %370 = vrot.lane.b32.xlu0 %v1152_v47, %s1269_s26 }
 0x401   :  { %374 = vrot.lane.b32.xlu0 %v1152_v47, %s1268_s25 }
 0x45d   :  { %v373_v35 = vpop.permute.xlu1 %372 }
 0x45e   :  { %v377_v49 = vmul.f32 %v1152_v47, %v373_v35 }
 0x46f   :  { %v371_v48 = vpop.permute.xlu0 %370 }
 0x470   :  { %v376_v50 = vmul.f32 %v371_v48, %v316_v28 }
 0x472   :  { %v378_v51 = vadd.f32 %v377_v49, %v376_v50 }
 0x473   :  { %v375_v53 = vpop.permute.xlu0 %374 }
 0x474   :  { %1153 = vtanh.f32 %v378_v51 }
 0x481   :  { %v1154_v52 = vpop.eup %1153 }
 0x482   :  { %v380_v54 = vmul.f32 %v1154_v52, %v375_v53 }
 0x484   :  { %v383_v55 = vpack.c.bf16 %v380_v54, %v380_v54 }
 0x486   :  { %1001 = vmatmul.mubr.bf16.vlgmr.msra.gmra.mxu0 %v383_v55 }
 0x487   :  { %1025 = vmatpush3.bf16.msra.mxu0 %v1316_v4  ;;  %1040 = vmatprep.mubr.msk.bf16.mxu0 %vm1266_vm0, %v1265_v0 }
 0x488   :  { %1026 = vmatprep.subr.bf16.mxu0 %v1265_v0 }
 0x48b   :  { %1027 = vmatpush3.bf16.msra.mxu0 %v1319_v6 }
 0x48c   :  { %1028 = vmatprep.subr.bf16.mxu0 %v1265_v0 }
 0x48f   :  { %1029 = vmatpush3.bf16.msra.mxu0 %v1338_v18 }
 0x490   :  { %1030 = vmatprep.subr.bf16.mxu0 %v1265_v0 }
 0x493   :  { %1031 = vmatpush3.bf16.msra.mxu0 %v1345_v21 }
 0x494   :  { %1032 = vmatprep.subr.bf16.mxu0 %v1265_v0 }
 0x497   :  { %1033 = vmatpush3.bf16.msra.mxu0 %v1351_v24 }
 0x498   :  { %1034 = vmatprep.subr.bf16.mxu0 %v1265_v0 }
 0x49b   :  { %1035 = vmatpush3.bf16.msra.mxu0 %v1357_v27 }
 0x49c   :  { %1036 = vmatprep.subr.bf16.mxu0 %v1265_v0 }
 0x49f   :  { %1037 = vmatpush3.bf16.msra.mxu0 %v1363_v30 }
 0x4a0   :  { %1038 = vmatprep.subr.bf16.mxu0 %v1265_v0 }
 0x4a3   :  { %1039 = vmatpush3.bf16.msra.mxu0 %v1369_v33 }
 0x4a4   :  { %1064 = vmatprep.subr.bf16.mxu0 %v1265_v0 }
 0x546   :  { %v418_v57 = vpop.f32.mrf.mxu0 }
 0x547   :  { %v424_v58 = vadd.f32 %v418_v57, %v143_v56  ;;  %v156_v56 = vadd.f32 %v1447_v3, %v1405_v36 }
 0x548   :  { %v1002_v59 = vpop.f32.mrf.mxu0 }
 0x549   :  { %v814_v60 = vmul.f32 -1.442695, %v424_v58  ;;  %1155 = vtanh.f32 %v424_v58 }
 0x54a   :  { %v421_v61 = vpop.f32.mrf.mxu0 }
 0x54b   :  { %1157 = vpow2.f32 %v814_v60 }
 0x54c   :  { %v1003_v62 = vpop.f32.mrf.mxu0 }
 0x556   :  { %v1156_v63 = vpop.eup %1155 }
 0x557   :  { %434 = vrot.lane.b32.xlu0 %v1156_v63, %s1270_s27 }
 0x558   :  { %v1158_v2 = vpop.eup %1157 }
 0x559   :  { %v428_v9 = vadd.f32 1.0, %v1158_v2 }
 0x55b   :  { %1159 = vrcp.f32 %v428_v9 }
 0x568   :  { %v1160_v10 = vpop.eup %1159 }
 0x569   :  { %432 = vrot.lane.b32.xlu1 %v1160_v10, %s1269_s26 }
 0x56d   :  { %436 = vrot.lane.b32.xlu1 %v1160_v10, %s1268_s25 }
 0x5c9   :  { %v435_v1 = vpop.permute.xlu0 %434 }
 0x5ca   :  { %v439_v12 = vmul.f32 %v1160_v10, %v435_v1 }
 0x5db   :  { %v433_v11 = vpop.permute.xlu1 %432 }
 0x5dc   :  { %v438_v13 = vmul.f32 %v433_v11, %v378_v51 }
 0x5de   :  { %v440_v14 = vadd.f32 %v439_v12, %v438_v13 }
 0x5df   :  { %v437_v16 = vpop.permute.xlu1 %436 }
 0x5e0   :  { %1161 = vtanh.f32 %v440_v14 }
 0x5ed   :  { %v1162_v15 = vpop.eup %1161 }
 0x5ee   :  { %v442_v17 = vmul.f32 %v1162_v15, %v437_v16 }
 0x5f0   :  { %v445_v19 = vpack.c.bf16 %v442_v17, %v442_v17 }
 0x5f2   :  { %1021 = vmatmul.mubr.bf16.vlgmr.msra.gmra.mxu1 %v445_v19  ;;  %v159_v19 = vadd.f32 %v1451_v7, %v1405_v36  ;;  %v706_v7 = vld [vmem:[#allocation8 + $0x50] sm:$0xff] }
 0x5f3   :  { %1045 = vmatpush3.bf16.msra.mxu1 %v1316_v4  ;;  %1060 = vmatprep.mubr.msk.bf16.mxu1 %vm1266_vm0, %v1265_v0 }
 0x5f4   :  { %1046 = vmatprep.subr.bf16.mxu1 %v1265_v0 }
 0x5f7   :  { %1047 = vmatpush3.bf16.msra.mxu1 %v1319_v6 }
 0x5f8   :  { %1048 = vmatprep.subr.bf16.mxu1 %v1265_v0 }
 0x5fb   :  { %1049 = vmatpush3.bf16.msra.mxu1 %v1338_v18 }
 0x5fc   :  { %1050 = vmatprep.subr.bf16.mxu1 %v1265_v0 }
 0x5ff   :  { %1051 = vmatpush3.bf16.msra.mxu1 %v1345_v21 }
 0x600   :  { %1052 = vmatprep.subr.bf16.mxu1 %v1265_v0 }
 0x603   :  { %1053 = vmatpush3.bf16.msra.mxu1 %v1351_v24 }
 0x604   :  { %1054 = vmatprep.subr.bf16.mxu1 %v1265_v0 }
 0x607   :  { %1055 = vmatpush3.bf16.msra.mxu1 %v1357_v27 }
 0x608   :  { %1056 = vmatprep.subr.bf16.mxu1 %v1265_v0 }
 0x60b   :  { %1057 = vmatpush3.bf16.msra.mxu1 %v1363_v30 }
 0x60c   :  { %1058 = vmatprep.subr.bf16.mxu1 %v1265_v0 }
 0x60f   :  { %1059 = vmatpush3.bf16.msra.mxu1 %v1369_v33 }
 0x610   :  { %1084 = vmatprep.subr.mxu1 %v1265_v0 }
 0x6b2   :  { %v480_v22 = vpop.f32.mrf.mxu1 }
 0x6b3   :  { %v486_v23 = vadd.f32 %v480_v22, %v148_v20 }
 0x6b4   :  { %v1022_v25 = vpop.f32.mrf.mxu1 }
 0x6b5   :  { %v815_v26 = vmul.f32 -1.442695, %v486_v23  ;;  %1163 = vtanh.f32 %v486_v23 }
 0x6b6   :  { %v483_v28 = vpop.f32.mrf.mxu1 }
 0x6b7   :  { %1165 = vpow2.f32 %v815_v26  ;;  %v711_v28 = vld [vmem:[#allocation8 + $0x78] sm:$0xff] }
 0x6b8   :  { %v1023_v29 = vpop.f32.mrf.mxu1 }
 0x6b9   :  { %v710_v29 = vld [vmem:[#allocation8 + $0x70] sm:$0xff] }
 0x6c2   :  { %v1164_v31 = vpop.eup %1163 }
 0x6c3   :  { %496 = vrot.lane.b32.xlu1 %v1164_v31, %s1270_s27 }
 0x6c4   :  { %v1166_v32 = vpop.eup %1165 }
 0x6c5   :  { %v490_v34 = vadd.f32 1.0, %v1166_v32  ;;  %v709_v32 = vld [vmem:[#allocation8 + $0x68] sm:$0xff] }
 0x6c7   :  { %1167 = vrcp.f32 %v490_v34  ;;  %v708_v34 = vld [vmem:[#allocation8 + $0x60] sm:$0xff] }
 0x6d4   :  { %v1168_v37 = vpop.eup %1167 }
 0x6d5   :  { %494 = vrot.lane.b32.xlu0 %v1168_v37, %s1269_s26 }
 0x6d9   :  { %498 = vrot.lane.b32.xlu0 %v1168_v37, %s1268_s25 }
 0x735   :  { %v497_v5 = vpop.permute.xlu1 %496 }
 0x736   :  { %v501_v39 = vmul.f32 %v1168_v37, %v497_v5 }
 0x747   :  { %v495_v38 = vpop.permute.xlu0 %494 }
 0x748   :  { %v500_v40 = vmul.f32 %v495_v38, %v440_v14 }
 0x74a   :  { %v502_v41 = vadd.f32 %v501_v39, %v500_v40  ;;  %v705_v39 = vld [vmem:[#allocation8 + $0x48] sm:$0xff]  ;;  %v704_v40 = vld [vmem:[#allocation8 + $0x40] sm:$0xff] }
 0x74b   :  { %v499_v43 = vpop.permute.xlu0 %498 }
 0x74c   :  { %1169 = vtanh.f32 %v502_v41 }
 0x759   :  { %v1170_v42 = vpop.eup %1169 }
 0x75a   :  { %v504_v44 = vmul.f32 %v1170_v42, %v499_v43  ;;  %v702_v42 = vld [vmem:[#allocation8 + $0x30] sm:$0xff]  ;;  %v701_v43 = vld [vmem:[#allocation8 + $0x28] sm:$0xff] }
 0x75c   :  { %v507_v45 = vpack.c.bf16 %v504_v44, %v504_v44  ;;  %v700_v44 = vld [vmem:[#allocation8 + $0x20] sm:$0xff] }
 0x75e   :  { %1041 = vmatmul.mubr.bf16.vlgmr.msra.gmra.mxu0 %v507_v45 }
 0x75f   :  { %1065 = vmatpush3.bf16.msra.mxu0 %v1316_v4  ;;  %1080 = vmatprep.mubr.msk.bf16.mxu0 %vm1266_vm0, %v1265_v0  ;;  %v151_v4 = vadd.f32 %v1405_v36, %v1453_v8  ;;  %v707_v36 = vld [vmem:[#allocation8 + $0x58] sm:$0xff] }
 0x760   :  { %1066 = vmatprep.subr.bf16.mxu0 %v1265_v0 }
 0x763   :  { %1067 = vmatpush3.bf16.msra.mxu0 %v1319_v6 }
 0x764   :  { %1068 = vmatprep.subr.bf16.mxu0 %v1265_v0 }
 0x767   :  { %1069 = vmatpush3.bf16.msra.mxu0 %v1338_v18 }
 0x768   :  { %1070 = vmatprep.subr.bf16.mxu0 %v1265_v0 }
 0x76b   :  { %1071 = vmatpush3.bf16.msra.mxu0 %v1345_v21 }
 0x76c   :  { %1072 = vmatprep.subr.bf16.mxu0 %v1265_v0 }
 0x76f   :  { %1073 = vmatpush3.bf16.msra.mxu0 %v1351_v24 }
 0x770   :  { %1074 = vmatprep.subr.bf16.mxu0 %v1265_v0 }
 0x773   :  { %1075 = vmatpush3.bf16.msra.mxu0 %v1357_v27 }
 0x774   :  { %1076 = vmatprep.subr.bf16.mxu0 %v1265_v0 }
 0x777   :  { %1077 = vmatpush3.bf16.msra.mxu0 %v1363_v30 }
 0x778   :  { %1078 = vmatprep.subr.bf16.mxu0 %v1265_v0 }
 0x77b   :  { %1079 = vmatpush3.bf16.msra.mxu0 %v1369_v33 }
 0x81e   :  { %v542_v6 = vpop.f32.mrf.mxu0 }
 0x81f   :  { %v548_v18 = vadd.f32 %v542_v6, %v151_v4  ;;  %v699_v4 = vld [vmem:[#allocation8 + $0x18] sm:$0xff]  ;;  %v698_v6 = vld [vmem:[#allocation8 + $0x10] sm:$0xff] }
 0x820   :  { %v1042_v21 = vpop.f32.mrf.mxu0 }
 0x821   :  { %v816_v46 = vmul.f32 -1.442695, %v548_v18  ;;  %1171 = vtanh.f32 %v548_v18  ;;  %v697_v18 = vld [vmem:[#allocation8 + $0x8] sm:$0xff]  ;;  %v696_v21 = vld [vmem:[#allocation8] sm:$0xff] }
 0x822   :  { %v545_v24 = vpop.f32.mrf.mxu0 }
 0x823   :  { %1173 = vpow2.f32 %v816_v46 }
 0x824   :  { %v1043_v47 = vpop.f32.mrf.mxu0 }
 0x82e   :  { %v1172_v27 = vpop.eup %1171 }
 0x82f   :  { %558 = vrot.lane.b32.xlu0 %v1172_v27, %s1270_s27 }
 0x830   :  { %v1174_v35 = vpop.eup %1173 }
 0x831   :  { %v552_v30 = vadd.f32 1.0, %v1174_v35 }
 0x833   :  { %1175 = vrcp.f32 %v552_v30 }
 0x840   :  { %v1176_v48 = vpop.eup %1175 }
 0x841   :  { %556 = vrot.lane.b32.xlu1 %v1176_v48, %s1269_s26 }
 0x845   :  { %560 = vrot.lane.b32.xlu1 %v1176_v48, %s1268_s25 }
 0x8a1   :  { %v559_v33 = vpop.permute.xlu0 %558 }
 0x8a2   :  { %v563_v49 = vmul.f32 %v1176_v48, %v559_v33 }
 0x8b3   :  { %v557_v8 = vpop.permute.xlu1 %556 }
 0x8b4   :  { %v562_v50 = vmul.f32 %v557_v8, %v502_v41  ;;  %v703_v41 = vld [vmem:[#allocation8 + $0x38] sm:$0xff]  ;;  %v819_v8 = vld [vmem:[%s1592_s5] ss:$0 sm:$0xff] }
 0x8b6   :  { %v564_v51 = vadd.f32 %v563_v49, %v562_v50 }
 0x8b7   :  { %v561_v53 = vpop.permute.xlu1 %560 }
 0x8b8   :  { %1177 = vtanh.f32 %v564_v51 }
 0x8c5   :  { %v1178_v52 = vpop.eup %1177 }
 0x8c6   :  { %v566_v54 = vmul.f32 %v1178_v52, %v561_v53 }
 0x8c8   :  { %v569_v55 = vpack.c.bf16 %v566_v54, %v566_v54 }
 0x8ca   :  { %1061 = vmatmul.mubr.bf16.vlgmr.msra.gmra.mxu1 %v569_v55 }
 0x8cb   :  { %1116 = vmatprep.mubr.msk.f32.mxu1 %vm1266_vm0, %v1265_v0  ;;  %1085 = vmatpush3.msra.mxu1 %v711_v28 }
 0x8cc   :  { %1086 = vmatprep.subr.mxu1 %v1265_v0 }
 0x8cd   :  { %1087 = vmatpush3.msra.mxu1 %v710_v29 }
 0x8ce   :  { %1088 = vmatprep.subr.mxu1 %v1265_v0 }
 0x8cf   :  { %1089 = vmatpush3.msra.mxu1 %v709_v32 }
 0x8d0   :  { %1090 = vmatprep.subr.mxu1 %v1265_v0 }
 0x8d1   :  { %1091 = vmatpush3.msra.mxu1 %v708_v34 }
 0x8d2   :  { %1092 = vmatprep.subr.mxu1 %v1265_v0 }
 0x8d3   :  { %1093 = vmatpush3.msra.mxu1 %v707_v36 }
 0x8d4   :  { %1094 = vmatprep.subr.mxu1 %v1265_v0 }
 0x8d5   :  { %1095 = vmatpush3.msra.mxu1 %v706_v7 }
 0x8d6   :  { %1096 = vmatprep.subr.mxu1 %v1265_v0 }
 0x8d7   :  { %1097 = vmatpush3.msra.mxu1 %v705_v39 }
 0x8d8   :  { %1098 = vmatprep.subr.mxu1 %v1265_v0 }
 0x8d9   :  { %1099 = vmatpush3.msra.mxu1 %v704_v40 }
 0x8da   :  { %1100 = vmatprep.subr.mxu1 %v1265_v0 }
 0x8db   :  { %1101 = vmatpush3.msra.mxu1 %v703_v41 }
 0x8dc   :  { %1102 = vmatprep.subr.mxu1 %v1265_v0 }
 0x8dd   :  { %1103 = vmatpush3.msra.mxu1 %v702_v42 }
 0x8de   :  { %1104 = vmatprep.subr.mxu1 %v1265_v0 }
 0x8df   :  { %1105 = vmatpush3.msra.mxu1 %v701_v43 }
 0x8e0   :  { %1106 = vmatprep.subr.mxu1 %v1265_v0 }
 0x8e1   :  { %1107 = vmatpush3.msra.mxu1 %v700_v44 }
 0x8e2   :  { %1108 = vmatprep.subr.mxu1 %v1265_v0 }
 0x8e3   :  { %1109 = vmatpush3.msra.mxu1 %v699_v4 }
 0x8e4   :  { %1110 = vmatprep.subr.mxu1 %v1265_v0 }
 0x8e5   :  { %1111 = vmatpush3.msra.mxu1 %v698_v6 }
 0x8e6   :  { %1112 = vmatprep.subr.mxu1 %v1265_v0 }
 0x8e7   :  { %1113 = vmatpush3.msra.mxu1 %v697_v18 }
 0x8e8   :  { %1114 = vmatprep.subr.mxu1 %v1265_v0 }
 0x8e9   :  { %1115 = vmatpush3.msra.mxu1 %v696_v21 }
 0x98a   :  { %v604_v57 = vpop.f32.mrf.mxu1 }
 0x98b   :  { %v610_v58 = vadd.f32 %v604_v57, %v156_v56 }
 0x98c   :  { %v1062_v59 = vpop.f32.mrf.mxu1 }
 0x98d   :  { %v817_v60 = vmul.f32 -1.442695, %v610_v58  ;;  %1179 = vtanh.f32 %v610_v58 }
 0x98e   :  { %v607_v61 = vpop.f32.mrf.mxu1 }
 0x98f   :  { %1181 = vpow2.f32 %v817_v60 }
 0x990   :  { %v1063_v62 = vpop.f32.mrf.mxu1 }
 0x99a   :  { %v1180_v63 = vpop.eup %1179 }
 0x99b   :  { %620 = vrot.lane.b32.xlu1 %v1180_v63, %s1270_s27 }
 0x99c   :  { %v1182_v2 = vpop.eup %1181 }
 0x99d   :  { %v614_v9 = vadd.f32 1.0, %v1182_v2 }
 0x99f   :  { %1183 = vrcp.f32 %v614_v9 }
 0x9ac   :  { %v1184_v10 = vpop.eup %1183 }
 0x9ad   :  { %618 = vrot.lane.b32.xlu0 %v1184_v10, %s1269_s26 }
 0x9b1   :  { %622 = vrot.lane.b32.xlu0 %v1184_v10, %s1268_s25 }
 0xa0d   :  { %v621_v3 = vpop.permute.xlu1 %620 }
 0xa0e   :  { %v625_v11 = vmul.f32 %v1184_v10, %v621_v3 }
 0xa1f   :  { %v619_v1 = vpop.permute.xlu0 %618 }
 0xa20   :  { %v624_v12 = vmul.f32 %v619_v1, %v564_v51 }
 0xa22   :  { %v1557_v13 = vadd.f32 %v625_v11, %v624_v12 }
 0xa23   :  { %v623_v15 = vpop.permute.xlu0 %622 }
 0xa24   :  { %1185 = vtanh.f32 %v1557_v13 }
 0xa31   :  { %v1186_v14 = vpop.eup %1185 }
 0xa32   :  { %v628_v16 = vmul.f32 %v1186_v14, %v623_v15 }
 0xa34   :  { %v631_v17 = vpack.c.bf16 %v628_v16, %v628_v16 }
 0xa36   :  { %1081 = vmatmul.mubr.bf16.vlgmr.msra.gmra.mxu0 %v631_v17 }
 0xaf6   :  { %v666_v20 = vpop.f32.mrf.mxu0 }
 0xaf7   :  { %v672_v22 = vadd.f32 %v666_v20, %v159_v19 }
 0xaf8   :  { %v1082_v23 = vpop.f32.mrf.mxu0 }
 0xaf9   :  { %v818_v25 = vmul.f32 -1.442695, %v672_v22  ;;  %1187 = vtanh.f32 %v672_v22 }
 0xafa   :  { %v669_v26 = vpop.f32.mrf.mxu0 }
 0xafb   :  { %1189 = vpow2.f32 %v818_v25 }
 0xafc   :  { %v1083_v31 = vpop.f32.mrf.mxu0 }
 0xb06   :  { %v1188_v37 = vpop.eup %1187 }
 0xb07   :  { %682 = vrot.lane.b32.xlu0 %v1188_v37, %s1270_s27 }
 0xb08   :  { %v1190_v5 = vpop.eup %1189 }
 0xb09   :  { %v676_v38 = vadd.f32 1.0, %v1190_v5 }
 0xb0b   :  { %1191 = vrcp.f32 %v676_v38 }
 0xb18   :  { %v1192_v45 = vpop.eup %1191 }
 0xb19   :  { %680 = vrot.lane.b32.xlu1 %v1192_v45, %s1269_s26 }
 0xb1d   :  { %684 = vrot.lane.b32.xlu1 %v1192_v45, %s1268_s25 }
 0xb79   :  { %v683_v46 = vpop.permute.xlu0 %682 }
 0xb7a   :  { %v687_v47 = vmul.f32 %v1192_v45, %v683_v46 }
 0xb8b   :  { %v681_v24 = vpop.permute.xlu1 %680 }
 0xb8c   :  { %v686_v27 = vmul.f32 %v681_v24, %v1557_v13 }
 0xb8e   :  { %v688_v35 = vadd.f32 %v687_v47, %v686_v27 }
 0xb8f   :  { %v685_v48 = vpop.permute.xlu1 %684 }
 0xb90   :  { %1193 = vtanh.f32 %v688_v35 }
 0xb9d   :  { %v1194_v30 = vpop.eup %1193 }
 0xb9e   :  { %v690_v33 = vmul.f32 %v1194_v30, %v685_v48 }
 0xba0   :  { %1117 = vmatmul.mubr.f32.vlgmr.msra.gmra.mxu1 %v690_v33 }
 0xc60   :  { %v785_v0 = vpop.f32.mrf.mxu1 }
 0xc61   :  { %v786_v49 = vadd.f32 %v819_v8, %v785_v0 }
 0xc62   :  { %v1118_v50 = vpop.f32.mrf.mxu1 }
 0xc63   :  { %789 = vst [vmem:[#allocation10] sm:$0xff] %v786_v49 }
 0xc64   :  { %1246 = shalt.err (!%p1243_p0)
}
 0xc65   :  { %799 = dma.vmem_to_hbm [thread:$0]  %s797_s30, 128, %s1593_s6, [#allocation7]  }
 0xc66   :  { %1259 = dma.done.wait [#allocation7], 128  }
 0xc67   :  { %1260 = vsyncadd [#allocation7], 4294967168 }
 0xc68   :  { %803 = vsyncpa [#allocation6], 1 }
 0xc69   :  { %804 = vsyncpa [#allocation9], 1 }
 0xc6a   :  { %805 = vsyncpa [#allocation7], 1 }

</bundles_post_ra>
